<compile_context>
chip_gen: v7x
topology: tpu7x:2x2x1
jax: 0.10.0
libtpu: 0.0.40
codegen_flags: <defaults>
</compile_context>

<pallas_src>
import jax
import jax.numpy as jnp
from jax.experimental import pallas as pl
from jax.experimental.pallas import tpu as pltpu


def cls_head_kernel(x_ref, w1_ref, b1_ref, w2_ref, b2_ref, o_ref):
    # x:(TB,H)  w1:(H,H)  b1:(1,H)  w2:(H,Cp)  b2:(1,Cp)  o:(TB,Cp)
    x = x_ref[...]                       # native dtype; MXU accumulates in f32
    h = jnp.dot(x, w1_ref[...], preferred_element_type=jnp.float32)
    h = jnp.tanh(h + b1_ref[...].astype(jnp.float32))        # bias + tanh (EUP)
    h = h.astype(w2_ref.dtype)           # back to weight dtype for native MXU rate
    y = jnp.dot(h, w2_ref[...], preferred_element_type=jnp.float32)
    y = y + b2_ref[...].astype(jnp.float32)
    o_ref[...] = y.astype(o_ref.dtype)


def banabert_cls_head(features, w_dense, b_dense, w_out, b_out, *, block_b=256):
    """features: (B, S, H). w_dense: (H, H) as (in, out). w_out: (H, C) as (in, out)."""
    B, S, H = features.shape
    C = w_out.shape[1]
    if H % 128 != 0:
        raise ValueError("hidden_size must be a multiple of the 128-lane width")

    # Lane-dense output width (class counts are tiny): pad to >=128 lanes so the
    # kernel writes unmasked full-lane stores; sliced back to C below.
    c_pad = max(128, pl.cdiv(C, 128) * 128)

    # Batch tile: 256 fills v6e/v7x MXU rows; use block_b=128 on v5e.
    tb = B if B <= block_b else block_b
    grid_b = pl.cdiv(B, tb)

    # Free contiguous reshape: row b of feat2d is [x_{b,0,:}, x_{b,1,:}, ...],
    # so the CLS token occupies exactly columns [0, H) -> gathered by BlockSpec.
    feat2d = features.reshape(B, S * H)

    w_out_p = jnp.pad(w_out, ((0, 0), (0, c_pad - C)))
    b_out_p = jnp.pad(b_out, ((0, c_pad - C),))

    itemsize = jnp.dtype(features.dtype).itemsize
    cost = pl.CostEstimate(
        flops=2 * B * H * (H + c_pad),
        transcendentals=B * H,
        bytes_accessed=(B * H + H * H + H + H * c_pad + c_pad + B * c_pad) * itemsize,
    )

    out = pl.pallas_call(
        cls_head_kernel,
        out_shape=jax.ShapeDtypeStruct((B, c_pad), features.dtype),
        grid_spec=pltpu.PrefetchScalarGridSpec(
            num_scalar_prefetch=0,
            grid=(grid_b,),
            in_specs=[
                pl.BlockSpec((tb, H), lambda i: (i, 0)),      # fused CLS gather
                pl.BlockSpec((H, H), lambda i: (0, 0)),       # w_dense (resident)
                pl.BlockSpec((1, H), lambda i: (0, 0)),       # b_dense (resident)
                pl.BlockSpec((H, c_pad), lambda i: (0, 0)),   # w_out   (resident)
                pl.BlockSpec((1, c_pad), lambda i: (0, 0)),   # b_out   (resident)
            ],
            out_specs=pl.BlockSpec((tb, c_pad), lambda i: (i, 0)),
        ),
        compiler_params=pltpu.CompilerParams(dimension_semantics=("parallel",)),
        cost_estimate=cost,
    )(feat2d, w_dense, b_dense.reshape(1, H), w_out_p, b_out_p.reshape(1, c_pad))

    return out[:, :C]


def reference(features, w_dense, b_dense, w_out, b_out):
    x = features[:, 0, :].astype(jnp.float32)
    h = jnp.tanh(x @ w_dense.astype(jnp.float32) + b_dense.astype(jnp.float32))
    y = h @ w_out.astype(jnp.float32) + b_out.astype(jnp.float32)
    return y.astype(features.dtype)


if __name__ == "__main__":
    # Small shapes consistent with the module (hidden kept lane-width aligned).
    B, S, H, C = 8, 8, 128, 4

    key = jax.random.PRNGKey(0)
    k_feat, k_w1, k_b1, k_w2, k_b2 = jax.random.split(key, 5)

    features = jax.random.normal(k_feat, (B, S, H), dtype=jnp.float32)

    # PyTorch nn.Linear stores (out, in); we keep the (in, out) transpose so the
    # kernel computes x @ W directly.
    bound1 = 1.0 / (H ** 0.5)
    w_dense = jax.random.uniform(k_w1, (H, H), jnp.float32, -bound1, bound1)
    b_dense = jax.random.uniform(k_b1, (H,), jnp.float32, -bound1, bound1)
    w_out = jax.random.uniform(k_w2, (H, C), jnp.float32, -bound1, bound1)
    b_out = jax.random.uniform(k_b2, (C,), jnp.float32, -bound1, bound1)

    head = jax.jit(banabert_cls_head)
    out = jax.block_until_ready(head(features, w_dense, b_dense, w_out, b_out))

    ref = reference(features, w_dense, b_dense, w_out, b_out)
    assert out.shape == (B, C), out.shape
    assert jnp.allclose(out, ref, atol=1e-4, rtol=1e-4), float(
        jnp.max(jnp.abs(out - ref))
    )

    print("KERNEL_OK")
</pallas_src>

<mosaic_0001>
module attributes {stable_mosaic.version = 11 : i64} {
  func.func @cls_head_kernel(%arg0: i32, %arg1: memref<8x128xf32, #tpu.memory_space<vmem>>, %arg2: memref<128x128xf32, #tpu.memory_space<vmem>>, %arg3: memref<1x128xf32, #tpu.memory_space<vmem>>, %arg4: memref<128x128xf32, #tpu.memory_space<vmem>>, %arg5: memref<1x128xf32, #tpu.memory_space<vmem>>, %arg6: memref<8x128xf32, #tpu.memory_space<vmem>>) attributes {dimension_semantics = [#tpu.dimension_semantics<parallel>], iteration_bounds = array<i64: 1>, scalar_prefetch = 0 : i64, scratch_operands = 0 : i64, tpu.core_type = #tpu.core_type<tc>, window_params = [{transform_indices = @transform_0, window_bounds = array<i64: 8, 128>}, {pipeline_mode = #tpu.pipeline_mode<synchronous>, transform_indices = @transform_1, window_bounds = array<i64: 128, 128>}, {pipeline_mode = #tpu.pipeline_mode<synchronous>, transform_indices = @transform_2, window_bounds = array<i64: 1, 128>}, {pipeline_mode = #tpu.pipeline_mode<synchronous>, transform_indices = @transform_3, window_bounds = array<i64: 128, 128>}, {pipeline_mode = #tpu.pipeline_mode<synchronous>, transform_indices = @transform_4, window_bounds = array<i64: 1, 128>}, {transform_indices = @transform_5, window_bounds = array<i64: 8, 128>}]} {
    %c0 = arith.constant 0 : index
    %c0_0 = arith.constant 0 : index
    %0 = vector.load %arg1[%c0, %c0_0] : memref<8x128xf32, #tpu.memory_space<vmem>>, vector<8x128xf32>
    %c0_1 = arith.constant 0 : index
    %c0_2 = arith.constant 0 : index
    %1 = vector.load %arg2[%c0_1, %c0_2] : memref<128x128xf32, #tpu.memory_space<vmem>>, vector<128x128xf32>
    %cst = arith.constant dense<0.000000e+00> : vector<8x128xf32>
    %2 = tpu.matmul %0, %1, %cst {dimension_numbers = #tpu.dot_dimension_numbers<[1], [0], [0], [1], [0, 0, 1, 1], [], []>} : vector<8x128xf32>, vector<128x128xf32>, vector<8x128xf32> -> vector<8x128xf32>
    %c0_3 = arith.constant 0 : index
    %c0_4 = arith.constant 0 : index
    %3 = vector.load %arg3[%c0_3, %c0_4] : memref<1x128xf32, #tpu.memory_space<vmem>>, vector<1x128xf32>
    %4 = vector.broadcast %3 : vector<1x128xf32> to vector<8x128xf32>
    %5 = arith.addf %2, %4 : vector<8x128xf32>
    %6 = math.tanh %5 : vector<8x128xf32>
    %c0_5 = arith.constant 0 : index
    %c0_6 = arith.constant 0 : index
    %7 = vector.load %arg4[%c0_5, %c0_6] : memref<128x128xf32, #tpu.memory_space<vmem>>, vector<128x128xf32>
    %cst_7 = arith.constant dense<0.000000e+00> : vector<8x128xf32>
    %8 = tpu.matmul %6, %7, %cst_7 {dimension_numbers = #tpu.dot_dimension_numbers<[1], [0], [0], [1], [0, 0, 1, 1], [], []>} : vector<8x128xf32>, vector<128x128xf32>, vector<8x128xf32> -> vector<8x128xf32>
    %c0_8 = arith.constant 0 : index
    %c0_9 = arith.constant 0 : index
    %9 = vector.load %arg5[%c0_8, %c0_9] : memref<1x128xf32, #tpu.memory_space<vmem>>, vector<1x128xf32>
    %10 = vector.broadcast %9 : vector<1x128xf32> to vector<8x128xf32>
    %11 = arith.addf %8, %10 : vector<8x128xf32>
    %c0_10 = arith.constant 0 : index
    %c0_11 = arith.constant 0 : index
    %12 = vector.load %arg6[%c0_10, %c0_11] : memref<8x128xf32, #tpu.memory_space<vmem>>, vector<8x128xf32>
    tpu.vector_store %arg6[%c0_10, %c0_11], %11 {strides = array<i32>} : memref<8x128xf32, #tpu.memory_space<vmem>>, vector<8x128xf32>,
    return
  }
  func.func @transform_0(%arg0: i32) -> (i32, i32) {
    %c0_i32 = arith.constant 0 : i32
    %c0_i32_0 = arith.constant 0 : i32
    return %arg0, %c0_i32 : i32, i32
  }
  func.func @transform_1(%arg0: i32) -> (i32, i32) {
    %c0_i32 = arith.constant 0 : i32
    %c0_i32_0 = arith.constant 0 : i32
    %c0_i32_1 = arith.constant 0 : i32
    return %c0_i32, %c0_i32_0 : i32, i32
  }
  func.func @transform_2(%arg0: i32) -> (i32, i32) {
    %c0_i32 = arith.constant 0 : i32
    %c0_i32_0 = arith.constant 0 : i32
    %c0_i32_1 = arith.constant 0 : i32
    return %c0_i32, %c0_i32_0 : i32, i32
  }
  func.func @transform_3(%arg0: i32) -> (i32, i32) {
    %c0_i32 = arith.constant 0 : i32
    %c0_i32_0 = arith.constant 0 : i32
    %c0_i32_1 = arith.constant 0 : i32
    return %c0_i32, %c0_i32_0 : i32, i32
  }
  func.func @transform_4(%arg0: i32) -> (i32, i32) {
    %c0_i32 = arith.constant 0 : i32
    %c0_i32_0 = arith.constant 0 : i32
    %c0_i32_1 = arith.constant 0 : i32
    return %c0_i32, %c0_i32_0 : i32, i32
  }
  func.func @transform_5(%arg0: i32) -> (i32, i32) {
    %c0_i32 = arith.constant 0 : i32
    %c0_i32_0 = arith.constant 0 : i32
    return %arg0, %c0_i32 : i32, i32
  }
}

</mosaic_0001>

<bundles_post_ra>
// kernel: banabert_cls_head.1
= control target key start
LH: loop header
LB: loop body
LE: loop exit
PB: predicated region body
PF: predicated region fallthrough
CT: control target
= control target key end

     0   :  { %v372_v0 = vmov 0.0|0.0   ;;  %vm373_vm0 = vmmov 0   ;;  %v374_v4 = vmov 0.0   ;;  %s529_s1 = inlined_call_operand.vmem [shape: f32[128,128], index: 1, kind: input, shape index: {}]   ;;  %s530_s3 = inlined_call_operand.vmem [shape: f32[128,128], index: 3, kind: input, shape index: {}]   ;;  %s531_s0 = inlined_call_operand.vmem [shape: f32[8,1024], index: 0, kind: input, shape index: {}]   ;;  %s532_s2 = inlined_call_operand.vmem [shape: f32[1,128], index: 2, kind: input, shape index: {}]   ;;  %s533_s4 = inlined_call_operand.vmem [shape: f32[1,128], index: 4, kind: input, shape index: {}]   ;;  %s534_s5 = inlined_call_operand.vmem [shape: f32[8,128], index: 5, kind: output, shape index: {}]  }
   0x1   :  { %319 = vmatprep.subr.bf16.mxu0 %v372_v0  ;;  %v21_v1 = vld [vmem:[%s529_s1] sm:$0xff]  ;;  %v22_v2 = vld [vmem:[%s529_s1 + $0x8] sm:$0xff]  ;;  %v23_v3 = vld [vmem:[%s529_s1 + $0x10] sm:$0xff]  ;;  %281 = vmatprep.mubr.msk.f32.mxu0 %vm373_vm0, %v374_v4 }
   0x2   :  { %v320_v5 = vpack.c.bf16 %v22_v2, %v21_v1  ;;  %v24_v6 = vld [vmem:[%s529_s1 + $0x18] sm:$0xff]  ;;  %343 = vmatprep.subr.bf16.mxu1 %v372_v0  ;;  %316 = vmatprep.mubr.msk.f32.mxu1 %vm373_vm0, %v374_v4  ;;  %v25_v8 = vld [vmem:[%s529_s1 + $0x20] sm:$0xff]  ;;  %v26_v9 = vld [vmem:[%s529_s1 + $0x28] sm:$0xff] }
   0x3   :  { %v323_v7 = vpack.c.bf16 %v24_v6, %v23_v3  ;;  %v115_v10 = vld [vmem:[%s530_s3] sm:$0xff]  ;;  %v116_v11 = vld [vmem:[%s530_s3 + $0x8] sm:$0xff]  ;;  %v117_v12 = vld [vmem:[%s530_s3 + $0x10] sm:$0xff]  ;;  %v326_v14 = vpack.c.bf16 %v26_v9, %v25_v8 }
   0x4   :  { %321 = vmatpush3.bf16.msra.mxu0 %v320_v5  ;;  %v118_v13 = vld [vmem:[%s530_s3 + $0x18] sm:$0xff]  ;;  %v344_v15 = vpack.c.bf16 %v116_v11, %v115_v10  ;;  %v27_v16 = vld [vmem:[%s529_s1 + $0x30] sm:$0xff]  ;;  %v119_v19 = vld [vmem:[%s530_s3 + $0x20] sm:$0xff] }
   0x5   :  { %322 = vmatprep.subr.bf16.mxu0 %v372_v0  ;;  %v28_v17 = vld [vmem:[%s529_s1 + $0x38] sm:$0xff]  ;;  %v347_v18 = vpack.c.bf16 %v118_v13, %v117_v12  ;;  %v120_v20 = vld [vmem:[%s530_s3 + $0x28] sm:$0xff]  ;;  %v29_v22 = vld [vmem:[%s529_s1 + $0x40] sm:$0xff] }
   0x6   :  { %345 = vmatpush3.bf16.msra.mxu1 %v344_v15  ;;  %v329_v21 = vpack.c.bf16 %v28_v17, %v27_v16  ;;  %v30_v23 = vld [vmem:[%s529_s1 + $0x48] sm:$0xff]  ;;  %v350_v24 = vpack.c.bf16 %v120_v20, %v119_v19  ;;  %v121_v25 = vld [vmem:[%s530_s3 + $0x30] sm:$0xff]  ;;  %v122_v26 = vld [vmem:[%s530_s3 + $0x38] sm:$0xff] }
   0x7   :  { %346 = vmatprep.subr.bf16.mxu1 %v372_v0  ;;  %v332_v27 = vpack.c.bf16 %v30_v23, %v29_v22  ;;  %v31_v28 = vld [vmem:[%s529_s1 + $0x50] sm:$0xff]  ;;  %v32_v29 = vld [vmem:[%s529_s1 + $0x58] sm:$0xff]  ;;  %v353_v30 = vpack.c.bf16 %v122_v26, %v121_v25  ;;  %v123_v31 = vld [vmem:[%s530_s3 + $0x40] sm:$0xff] }
   0x8   :  { %324 = vmatpush3.bf16.msra.mxu0 %v323_v7  ;;  %v124_v32 = vld [vmem:[%s530_s3 + $0x48] sm:$0xff]  ;;  %v335_v33 = vpack.c.bf16 %v32_v29, %v31_v28  ;;  %v33_v34 = vld [vmem:[%s529_s1 + $0x60] sm:$0xff]  ;;  %v35_v38 = vld [vmem:[%s529_s1 + $0x70] sm:$0xff] }
   0x9   :  { %325 = vmatprep.subr.bf16.mxu0 %v372_v0  ;;  %v34_v35 = vld [vmem:[%s529_s1 + $0x68] sm:$0xff]  ;;  %v356_v36 = vpack.c.bf16 %v124_v32, %v123_v31  ;;  %v36_v39 = vld [vmem:[%s529_s1 + $0x78] sm:$0xff]  ;;  %v20_v41 = vld [vmem:[%s531_s0] sm:$0xff] }
   0xa   :  { %348 = vmatpush3.bf16.msra.mxu1 %v347_v18  ;;  %v338_v37 = vpack.c.bf16 %v34_v35, %v33_v34  ;;  %v341_v40 = vpack.c.bf16 %v36_v39, %v35_v38  ;;  %v125_v42 = vld [vmem:[%s530_s3 + $0x50] sm:$0xff]  ;;  %v126_v43 = vld [vmem:[%s530_s3 + $0x58] sm:$0xff]  ;;  %v127_v45 = vld [vmem:[%s530_s3 + $0x60] sm:$0xff] }
   0xb   :  { %349 = vmatprep.subr.bf16.mxu1 %v372_v0  ;;  %v359_v44 = vpack.c.bf16 %v126_v43, %v125_v42  ;;  %v128_v46 = vld [vmem:[%s530_s3 + $0x68] sm:$0xff]  ;;  %v129_v48 = vld [vmem:[%s530_s3 + $0x70] sm:$0xff]  ;;  %v130_v49 = vld [vmem:[%s530_s3 + $0x78] sm:$0xff] }
   0xc   :  { %327 = vmatpush3.bf16.msra.mxu0 %v326_v14  ;;  %v362_v47 = vpack.c.bf16 %v128_v46, %v127_v45  ;;  %v365_v50 = vpack.c.bf16 %v130_v49, %v129_v48  ;;  %v213_v51 = vld [vmem:[%s532_s2] ss:$0 sm:$0xff] }
   0xd   :  { %328 = vmatprep.subr.bf16.mxu0 %v372_v0  ;;  %v214_v56 = vld [vmem:[%s533_s4] ss:$0 sm:$0xff] }
   0xe   :  { %351 = vmatpush3.bf16.msra.mxu1 %v350_v24 }
   0xf   :  { %352 = vmatprep.subr.bf16.mxu1 %v372_v0 }
  0x10   :  { %330 = vmatpush3.bf16.msra.mxu0 %v329_v21 }
  0x11   :  { %331 = vmatprep.subr.bf16.mxu0 %v372_v0 }
  0x12   :  { %354 = vmatpush3.bf16.msra.mxu1 %v353_v30 }
  0x13   :  { %355 = vmatprep.subr.bf16.mxu1 %v372_v0 }
  0x14   :  { %333 = vmatpush3.bf16.msra.mxu0 %v332_v27 }
  0x15   :  { %334 = vmatprep.subr.bf16.mxu0 %v372_v0 }
  0x16   :  { %357 = vmatpush3.bf16.msra.mxu1 %v356_v36 }
  0x17   :  { %358 = vmatprep.subr.bf16.mxu1 %v372_v0 }
  0x18   :  { %336 = vmatpush3.bf16.msra.mxu0 %v335_v33 }
  0x19   :  { %337 = vmatprep.subr.bf16.mxu0 %v372_v0 }
  0x1a   :  { %360 = vmatpush3.bf16.msra.mxu1 %v359_v44 }
  0x1b   :  { %361 = vmatprep.subr.bf16.mxu1 %v372_v0 }
  0x1c   :  { %339 = vmatpush3.bf16.msra.mxu0 %v338_v37 }
  0x1d   :  { %340 = vmatprep.subr.bf16.mxu0 %v372_v0 }
  0x1e   :  { %363 = vmatpush3.bf16.msra.mxu1 %v362_v47 }
  0x1f   :  { %364 = vmatprep.subr.bf16.mxu1 %v372_v0 }
  0x20   :  { %342 = vmatpush3.bf16.msra.mxu0 %v341_v40 }
  0x22   :  { %366 = vmatpush3.bf16.msra.mxu1 %v365_v50 }
  0x23   :  { %282 = vmatmul.mubr.f32.vlgmr.msra.gmra.mrb[0].mxu0 %v20_v41 }
  0xf6   :  { %v110_v52 = vpop.f32.mrb[0].mxu0 }
  0xf7   :  { %v111_v53 = vadd.f32 %v213_v51, %v110_v52  ;;  %v283_v54 = vpop.f32.mrb[1].mxu0 }
  0xf9   :  { %370 = vtanh.f32 %v111_v53 }
 0x103   :  { %v371_v55 = vpop.eup %370 }
 0x104   :  { %317 = vmatmul.mubr.f32.vlgmr.msra.gmra.mrb[0].mxu1 %v371_v55 }
 0x1d7   :  { %v204_v57 = vpop.f32.mrb[0].mxu1 }
 0x1d8   :  { %v205_v58 = vadd.f32 %v214_v56, %v204_v57  ;;  %v318_v59 = vpop.f32.mrb[1].mxu1 }
 0x1da   :  { %208 = vst [vmem:[%s534_s5] sm:$0xff] %v205_v58 }

</bundles_post_ra>
